<compile_context>
chip_gen: v7x
topology: tpu7x:2x2x1
jax: 0.10.0
libtpu: 0.0.40
codegen_flags: <defaults>
</compile_context>

<pallas_src>
import jax
import jax.numpy as jnp
from jax.experimental import pallas as pl
from jax.experimental.pallas import tpu as pltpu


def _similarity_kernel(x_ref, keyt_ref, sim_ref, xnorm_ref):
    # x_ref:   [tb, N, D] storage dtype (f32 or bf16)
    # keyt_ref:[D, P_pad] f32, already L2-normalized and transposed in the wrapper
    n = x_ref.shape[1]
    # embedding_key == 'mean'.  We normalize the raw sum instead of the mean
    # (L2 normalization is scale-invariant), so the eps clamp is scaled by N^2
    # to keep parity with the torch mean->normalize path on near-zero inputs.
    eps = jnp.float32(1e-12) * jnp.float32(n * n)

    # N-reduction with f32 accumulation (no explicit full-tile f32 cast kept live).
    x_sum = jnp.sum(x_ref[...], axis=1, dtype=jnp.float32)               # [tb, D]

    sq = jnp.sum(x_sum * x_sum, axis=-1, keepdims=True)                  # [tb, 1]
    x_norm = x_sum * jax.lax.rsqrt(jnp.maximum(sq, eps))                 # [tb, D]

    # similarity = x_norm @ key_norm.T ; the key operand arrives pre-transposed
    # as [D, P_pad], so this is a canonical [M,K]x[K,N] MXU contraction and the
    # [tb, P_pad] store is lane-dense (P_pad % 128 == 0).
    sim_ref[...] = jnp.dot(x_norm, keyt_ref[...],
                           preferred_element_type=jnp.float32)           # [tb, P_pad]
    xnorm_ref[...] = x_norm


def _l2_normalize(x, axis=-1, eps=1e-12):
    x = x.astype(jnp.float32)
    sq = jnp.sum(x * x, axis=axis, keepdims=True)
    return x * jax.lax.rsqrt(jnp.maximum(sq, jnp.float32(eps)))


def _vmem_budgets():
    """Per-generation (tile_budget_bytes, scoped_vmem_limit_bytes)."""
    try:
        cap = pltpu.get_tpu_info().vmem_capacity_bytes
    except Exception:  # be conservative if the query is unavailable
        cap = 64 * 1024 * 1024
    if cap <= 64 * 1024 * 1024:
        # v7x: 64 MiB VMEM per TensorCore -> keep generous headroom.
        return 24 * 1024 * 1024, 40 * 1024 * 1024
    # v5e / v6e: 128 MiB VMEM -> larger tiles, higher scoped limit.
    return 48 * 1024 * 1024, 96 * 1024 * 1024


def _pick_batch_tile(B, N, D, itemsize, tile_budget_bytes, min_steps=4):
    """Batch-tile size for the similarity kernel.

    Charges the full per-step VMEM footprint of the x_embed slab:
    2 double-buffered storage-dtype copies + one f32 working copy inside the
    kernel, i.e. (2*itemsize + 4) bytes per element.  Also caps the tile so the
    grid has at least `min_steps` steps (megacore sharding on v7x + DMA/compute
    overlap on all generations), unless that would push the per-step input slab
    below ~1 MiB, and prefers a tile size that divides B.
    """
    if B <= 8:
        return B

    row_resident = N * D * (2 * itemsize + 4)   # resident bytes per batch row
    row_dma = N * D * itemsize                  # HBM bytes per batch row

    tb_budget = max(8, (tile_budget_bytes // row_resident) // 8 * 8)

    # Smallest tile whose input slab is still >= ~1 MiB (per-step overhead ~0.35 us).
    tb_min_slab = max(8, ((-(-(1 << 20) // row_dma)) + 7) // 8 * 8)

    # Tile size that yields >= min_steps grid steps.
    tb_steps = max(8, (B // min_steps) // 8 * 8)

    tb = min(B, tb_budget, max(tb_steps, tb_min_slab))
    tb = max(8, (tb // 8) * 8)
    tb = min(tb, B)

    # Prefer a tb that divides B (avoid a padded/masked final block), but never
    # shrink by more than 2x to find a divisor.
    if B % tb != 0:
        for cand in range(tb, 7, -8):
            if B % cand == 0:
                if cand * 2 >= tb:
                    tb = cand
                break
    return tb


def eprompt_forward(x_embed, prompt, prompt_key, top_k, prompt_mask=None):
    """prompt_pool=True, embedding_key='mean', use_prefix_tune_for_e_prompt=False,
    batchwise_prompt=False."""
    B, N, D = x_embed.shape
    P = prompt_key.shape[0]
    L, _, length, _ = prompt.shape

    # l2_normalize(prompt_key, dim=-1): tiny [P, D] op done once outside the grid so
    # every kernel output is indexed only by the parallel batch axis (no revisiting).
    key_norm = _l2_normalize(prompt_key, axis=-1)                         # [P, D] f32

    # Pre-transpose (and zero-pad P up to a multiple of 128) for a canonical MXU
    # contraction and a lane-dense similarity store inside the kernel.
    P_pad = -(-P // 128) * 128
    key_norm_t = key_norm.T                                               # [D, P]
    if P_pad != P:
        key_norm_t = jnp.pad(key_norm_t, ((0, 0), (0, P_pad - P)))        # [D, P_pad]

    tile_budget, scoped_vmem = _vmem_budgets()
    tb = _pick_batch_tile(B, N, D, x_embed.dtype.itemsize, tile_budget)
    grid = (pl.cdiv(B, tb),)

    # TODO(synk): on v5e a deeper prefetch (pipeline_mode=pl.Buffered(3) on the
    # x_embed BlockSpec) could be enabled when the grid is deep enough; kept at the
    # default double-buffering here for portability.
    sim_pad, x_norm = pl.pallas_call(
        _similarity_kernel,
        grid=grid,
        in_specs=[
            pl.BlockSpec((tb, N, D), lambda i: (i, 0, 0)),                # batch-tiled
            pl.BlockSpec((D, P_pad), lambda i: (0, 0)),                   # resident keys^T
        ],
        out_specs=[
            pl.BlockSpec((tb, P_pad), lambda i: (i, 0)),
            pl.BlockSpec((tb, D), lambda i: (i, 0)),
        ],
        out_shape=(
            jax.ShapeDtypeStruct((B, P_pad), jnp.float32),
            jax.ShapeDtypeStruct((B, D), jnp.float32),
        ),
        compiler_params=pltpu.CompilerParams(
            dimension_semantics=("parallel",),
            vmem_limit_bytes=scoped_vmem,
        ),
    )(x_embed, key_norm_t)

    # Drop the padded key columns before top_k (padded sims are exactly 0 and could
    # otherwise outrank all-negative real sims).
    sim = sim_pad[:, :P] if P_pad != P else sim_pad

    # top-k prompt selection (data-dependent, small) in plain JAX glue.
    similarity_top_k, idx = jax.lax.top_k(sim, top_k)                     # [B, K]
    # TODO(synk): batchwise_prompt branch (torch.unique + counts) produces
    # dynamic-shaped intermediates; not implemented (batchwise_prompt=False).
    if prompt_mask is not None:
        idx = prompt_mask

    # gather from the pool: prompt[:, idx] -> [L, B, K, length, D]
    batched_prompt_raw = jnp.take(prompt, idx, axis=1)
    batched_prompt = batched_prompt_raw.reshape(L, B, top_k * length, D)

    # selected normalized keys: key_norm[idx] -> [B, K, D]
    batched_key_norm = jnp.take(key_norm, idx, axis=0)

    # reduce_sim = sum_{b,k} key_norm[idx[b,k]] . x_norm[b] / B
    #            = sum(take_along_axis(sim, idx, 1)) / B  (sim already holds the dots)
    reduce_sim = jnp.sum(jnp.take_along_axis(sim, idx, axis=1)) / jnp.float32(B)

    out = {
        "similarity": sim,
        "prompt_idx": idx,
        "selected_key": batched_key_norm,
        "prompt_key_norm": key_norm,
        "x_embed_norm": x_norm,
        "reduce_sim": reduce_sim,
        "batched_prompt": batched_prompt,
    }
    return out


def _reference_forward(x_embed, prompt, prompt_key, top_k):
    """Pure-JAX reference mirroring the PyTorch module (for a correctness check)."""
    B, N, D = x_embed.shape
    L, _, length, _ = prompt.shape
    x_mean = jnp.mean(x_embed.astype(jnp.float32), axis=1)
    key_norm = _l2_normalize(prompt_key, axis=-1)
    x_norm = _l2_normalize(x_mean, axis=-1)
    sim = x_norm @ key_norm.T
    _, idx = jax.lax.top_k(sim, top_k)
    batched_prompt = jnp.take(prompt, idx, axis=1).reshape(L, B, top_k * length, D)
    batched_key_norm = jnp.take(key_norm, idx, axis=0)
    reduce_sim = jnp.sum(batched_key_norm * x_norm[:, None, :]) / B
    return sim, x_norm, key_norm, idx, batched_prompt, reduce_sim


if __name__ == "__main__":
    # Small config consistent with EPrompt(__init__):
    #   length=5, embed_dim=32, prompt_pool=True, prompt_key=True,
    #   pool_size=8, top_k=2, num_layers=1, use_prefix_tune_for_e_prompt=False
    B, N, D = 2, 8, 32
    pool_size, top_k, length, num_layers = 8, 2, 5, 1

    root = jax.random.PRNGKey(0)
    k_prompt, k_key, k_x = jax.random.split(root, 3)

    # prompt_init='uniform' -> uniform(-1, 1); prompt_key_init='uniform' -> uniform(-1, 1)
    prompt = jax.random.uniform(
        k_prompt, (num_layers, pool_size, length, D), jnp.float32, minval=-1.0, maxval=1.0
    )
    prompt_key = jax.random.uniform(
        k_key, (pool_size, D), jnp.float32, minval=-1.0, maxval=1.0
    )
    x_embed = jax.random.normal(k_x, (B, N, D), jnp.float32)

    out = eprompt_forward(x_embed, prompt, prompt_key, top_k)
    jax.block_until_ready(out)

    assert out["similarity"].shape == (B, pool_size)
    assert out["prompt_idx"].shape == (B, top_k)
    assert out["selected_key"].shape == (B, top_k, D)
    assert out["batched_prompt"].shape == (num_layers, B, top_k * length, D)
    assert out["reduce_sim"].shape == ()

    # numerical check against a plain-JAX reference
    sim_r, xn_r, kn_r, idx_r, bp_r, rs_r = _reference_forward(x_embed, prompt, prompt_key, top_k)
    assert jnp.allclose(out["similarity"], sim_r, atol=1e-5)
    assert jnp.allclose(out["x_embed_norm"], xn_r, atol=1e-5)
    assert jnp.allclose(out["prompt_key_norm"], kn_r, atol=1e-5)
    assert jnp.array_equal(out["prompt_idx"], idx_r)
    assert jnp.allclose(out["batched_prompt"], bp_r, atol=1e-5)
    assert jnp.allclose(out["reduce_sim"], rs_r, atol=1e-5)

    print("KERNEL_OK")
</pallas_src>

<mosaic_0001>
module attributes {stable_mosaic.version = 11 : i64} {
  func.func @_similarity_kernel(%arg0: i32, %arg1: memref<2x8x32xf32, #tpu.memory_space<vmem>>, %arg2: memref<32x128xf32, #tpu.memory_space<vmem>>, %arg3: memref<2x128xf32, #tpu.memory_space<vmem>>, %arg4: memref<2x32xf32, #tpu.memory_space<vmem>>) attributes {dimension_semantics = [#tpu.dimension_semantics<parallel>], iteration_bounds = array<i64: 1>, scalar_prefetch = 0 : i64, scratch_operands = 0 : i64, tpu.core_type = #tpu.core_type<tc>, window_params = [{transform_indices = @transform_0, window_bounds = array<i64: 2, 8, 32>}, {pipeline_mode = #tpu.pipeline_mode<synchronous>, transform_indices = @transform_1, window_bounds = array<i64: 32, 128>}, {transform_indices = @transform_2, window_bounds = array<i64: 2, 128>}, {transform_indices = @transform_3, window_bounds = array<i64: 2, 32>}]} {
    %cst = arith.constant 9.99999996E-13 : f32
    %cst_0 = arith.constant 6.400000e+01 : f32
    %0 = arith.mulf %cst, %cst_0 : f32
    %c0 = arith.constant 0 : index
    %c0_1 = arith.constant 0 : index
    %c0_2 = arith.constant 0 : index
    %1 = vector.load %arg1[%c0, %c0_1, %c0_2] : memref<2x8x32xf32, #tpu.memory_space<vmem>>, vector<2x8x32xf32>
    %cst_3 = arith.constant dense<0.000000e+00> : vector<2x32xf32>
    %2 = vector.multi_reduction <add>, %1, %cst_3 [1] : vector<2x8x32xf32> to vector<2x32xf32>
    %3 = arith.mulf %2, %2 : vector<2x32xf32>
    %cst_4 = arith.constant dense<0.000000e+00> : vector<2xf32>
    %4 = vector.multi_reduction <add>, %3, %cst_4 [1] : vector<2x32xf32> to vector<2xf32>
    %5 = vector.shape_cast %4 : vector<2xf32> to vector<2x1xf32>
    %6 = vector.broadcast %0 : f32 to vector<2x1xf32>
    %7 = arith.maximumf %5, %6 : vector<2x1xf32>
    %8 = math.rsqrt %7 : vector<2x1xf32>
    %9 = vector.broadcast %8 : vector<2x1xf32> to vector<2x32xf32>
    %10 = arith.mulf %2, %9 : vector<2x32xf32>
    %c0_5 = arith.constant 0 : index
    %c0_6 = arith.constant 0 : index
    %11 = vector.load %arg2[%c0_5, %c0_6] : memref<32x128xf32, #tpu.memory_space<vmem>>, vector<32x128xf32>
    %cst_7 = arith.constant dense<0.000000e+00> : vector<2x128xf32>
    %12 = tpu.matmul %10, %11, %cst_7 {dimension_numbers = #tpu.dot_dimension_numbers<[1], [0], [0], [1], [0, 0, 1, 1], [], []>} : vector<2x32xf32>, vector<32x128xf32>, vector<2x128xf32> -> vector<2x128xf32>
    %c0_8 = arith.constant 0 : index
    %c0_9 = arith.constant 0 : index
    %13 = vector.load %arg3[%c0_8, %c0_9] : memref<2x128xf32, #tpu.memory_space<vmem>>, vector<2x128xf32>
    tpu.vector_store %arg3[%c0_8, %c0_9], %12 {strides = array<i32>} : memref<2x128xf32, #tpu.memory_space<vmem>>, vector<2x128xf32>,
    %c0_10 = arith.constant 0 : index
    %c0_11 = arith.constant 0 : index
    %14 = vector.load %arg4[%c0_10, %c0_11] : memref<2x32xf32, #tpu.memory_space<vmem>>, vector<2x32xf32>
    tpu.vector_store %arg4[%c0_10, %c0_11], %10 {strides = array<i32>} : memref<2x32xf32, #tpu.memory_space<vmem>>, vector<2x32xf32>,
    return
  }
  func.func @transform_0(%arg0: i32) -> (i32, i32, i32) {
    %c0_i32 = arith.constant 0 : i32
    %c0_i32_0 = arith.constant 0 : i32
    %c0_i32_1 = arith.constant 0 : i32
    return %arg0, %c0_i32, %c0_i32_0 : i32, i32, i32
  }
  func.func @transform_1(%arg0: i32) -> (i32, i32) {
    %c0_i32 = arith.constant 0 : i32
    %c0_i32_0 = arith.constant 0 : i32
    %c0_i32_1 = arith.constant 0 : i32
    return %c0_i32, %c0_i32_0 : i32, i32
  }
  func.func @transform_2(%arg0: i32) -> (i32, i32) {
    %c0_i32 = arith.constant 0 : i32
    %c0_i32_0 = arith.constant 0 : i32
    return %arg0, %c0_i32 : i32, i32
  }
  func.func @transform_3(%arg0: i32) -> (i32, i32) {
    %c0_i32 = arith.constant 0 : i32
    %c0_i32_0 = arith.constant 0 : i32
    return %arg0, %c0_i32 : i32, i32
  }
}

</mosaic_0001>

<bundles_post_ra>
// kernel: tpu_custom_call.1
= control target key start
LH: loop header
LB: loop body
LE: loop exit
PB: predicated region body
PF: predicated region fallthrough
CT: control target
= control target key end

     0   :  { %9 = vsyncpa [#allocation3], 0  ;;  %s406_s0 = inlined_call_operand.hbm [shape: f32[2,8,32], index: 0, kind: input, shape index: {}]   ;;  %s407_s1 = inlined_call_operand.hbm [shape: f32[32,128], index: 1, kind: input, shape index: {}]   ;;  %s408_s2 = inlined_call_operand.hbm [shape: f32[2,128], index: 2, kind: output, shape index: {0}]   ;;  %s409_s3 = inlined_call_operand.hbm [shape: f32[2,32], index: 3, kind: output, shape index: {1}]  }
   0x1   :  { %10 = vsyncpa [#allocation6], 0 }
   0x2   :  { %11 = vsyncpa [#allocation4], 0 }
   0x3   :  { %12 = vsyncpa [#allocation9], 0  ;;  %s322_s12 = smov [#allocation2]   ;;  %s226_s16 = scalar_lea.hbm %s406_s0, 256 }
   0x4   :  { %s18_s13 = sshll.u32 %s322_s12, 4  ;;  %p227_p0 = scmp.ne.s32.totalorder %s406_s0, %s226_s16  ;;  %s19_s13 = int_to_ptr.vmem [resolvable:$true] %s18_s13 }
   0x5   :  { %p230_p1 = scmp.lt.u32.totalorder %s226_s16, %s406_s0 }
   0x7   :  { %p232_p2 = pnand %p230_p1, %p227_p0 }
   0x9   :  { %235 = shalt.err (!%p232_p2)
}
   0xa   :  { %s236_s21 = scalar_lea.vmem %s19_s13, 256  ;;  %p241_p4 = scmp.lt.s32.totalorder %s19_s13, %s19_s13 }
   0xb   :  { %p237_p3 = scmp.ne.s32.totalorder %s19_s13, %s236_s21  ;;  %p242_p5 = scmp.lt.s32.totalorder %s236_s21, %s236_s21 }
   0xd   :  { %p243_p6 = por %p242_p5, %p241_p4 }
   0xf   :  { %p244_p7 = pnand %p243_p6, %p237_p3 }
  0x11   :  { %247 = shalt.err (!%p244_p7)
}
  0x12   :  { %s323_s22 = smov 128   ;;  %s324_s23 = smov 8  }
  0x13   :  { %24 = dma.hbm_to_vmem [thread:$0]  %s406_s0, 256, %s19_s13, [#allocation3], %s323_s22, %s323_s22, %s324_s23  }
  0x14   :  { %s325_s26 = smov [#allocation5]   ;;  %s248_s30 = scalar_lea.hbm %s407_s1, 512 }
  0x15   :  { %s30_s27 = sshll.u32 %s325_s26, 4  ;;  %p249_p8 = scmp.ne.s32.totalorder %s407_s1, %s248_s30  ;;  %s31_s27 = int_to_ptr.vmem [resolvable:$true] %s30_s27 }
  0x16   :  { %p252_p9 = scmp.lt.u32.totalorder %s248_s30, %s407_s1 }
  0x18   :  { %p254_p10 = pnand %p252_p9, %p249_p8 }
  0x1a   :  { %257 = shalt.err (!%p254_p10)
}
  0x1b   :  { %s258_s8 = scalar_lea.vmem %s31_s27, 512  ;;  %p263_p12 = scmp.lt.s32.totalorder %s31_s27, %s31_s27 }
  0x1c   :  { %p259_p11 = scmp.ne.s32.totalorder %s31_s27, %s258_s8  ;;  %p264_p13 = scmp.lt.s32.totalorder %s258_s8, %s258_s8 }
  0x1e   :  { %p265_p0 = por %p264_p13, %p263_p12 }
  0x20   :  { %p266_p1 = pnand %p265_p0, %p259_p11 }
  0x22   :  { %269 = shalt.err (!%p266_p1)
}
  0x23   :  { %36 = dma.hbm_to_vmem [thread:$0]  %s407_s1, 512, %s31_s27, [#allocation6], %s323_s22, %s323_s22, %s324_s23  }
  0x24   :  { %314 = dma.done.wait [#allocation3], 256  }
  0x25   :  { %315 = vsyncadd [#allocation3], 4294967040 }
  0x26   :  { %316 = dma.done.wait [#allocation6], 512  }
  0x27   :  { %317 = vsyncadd [#allocation6], 4294966784  ;;  %vm45_vm0 = vcmask 261120   ;;  %v43_v0 = vld [vmem:[#allocation2] sm:$0xff]  ;;  %v44_v1 = vld [vmem:[#allocation2 + $0x8] sm:$0xff]  ;;  %vm64_vm1 = vcmask 1041409  }
  0x28   :  { %v46_v2 = vsel %vm45_vm0, %v43_v0, 0.0  ;;  %v53_v3 = vsel %vm45_vm0, %v44_v1, 0.0  ;;  %vm67_vm2 = vcmask 254976   ;;  %v79_v20 = vld [vmem:[#allocation5] sm:$0xff]  ;;  %v80_v21 = vld [vmem:[#allocation5 + $0x8] sm:$0xff]  ;;  %v81_v22 = vld [vmem:[#allocation5 + $0x10] sm:$0xff] }
  0x29   :  { %v47_v4 = vrot.slane %v46_v2, 4  ;;  %v54_v5 = vrot.slane %v53_v3, 4  ;;  %v326_v23 = vmov 0.0|0.0   ;;  %v210_v24 = vpack.c.bf16 %v80_v21, %v79_v20  ;;  %v82_v25 = vld [vmem:[#allocation5 + $0x18] sm:$0xff]  ;;  %s329_s1 = smov [#allocation8]  }
  0x2a   :  { %209 = vmatprep.subr.bf16.mxu0 %v326_v23  ;;  %vm327_vm3 = vmmov 0   ;;  %v328_v26 = vmov 0.0   ;;  %v213_v27 = vpack.c.bf16 %v82_v25, %v81_v22  ;;  %s178_s10 = sshll.u32 %s329_s1, 4  ;;  %s179_s10 = int_to_ptr.vmem [resolvable:$true] %s178_s10 }
  0x2b   :  { %v48_v6 = vadd.f32 %v47_v4, %v46_v2  ;;  %v55_v7 = vadd.f32 %v54_v5, %v53_v3  ;;  %206 = vmatprep.mubr.msk.f32.mxu0 %vm327_vm3, %v328_v26  ;;  %211 = vmatpush3.bf16.msra.mxu0 %v210_v24  ;;  %s270_s11 = scalar_lea.vmem %s179_s10, 32  ;;  %p275_p3 = scmp.lt.s32.totalorder %s179_s10, %s179_s10 }
  0x2c   :  { %212 = vmatprep.subr.bf16.mxu0 %v326_v23  ;;  %p271_p2 = scmp.ne.s32.totalorder %s179_s10, %s270_s11  ;;  %p276_p4 = scmp.lt.s32.totalorder %s270_s11, %s270_s11 }
  0x2d   :  { %v49_v8 = vrot.slane %v48_v6, 2  ;;  %v56_v9 = vrot.slane %v55_v7, 2 }
  0x2e   :  { %p277_p5 = por %p276_p4, %p275_p3 }
  0x2f   :  { %v50_v10 = vadd.f32 %v49_v8, %v48_v6  ;;  %v57_v11 = vadd.f32 %v56_v9, %v55_v7  ;;  %214 = vmatpush3.bf16.msra.mxu0 %v213_v27 }
  0x30   :  { %p278_p6 = pnand %p277_p5, %p271_p2 }
  0x31   :  { %v51_v12 = vrot.slane %v50_v10, 1  ;;  %v58_v13 = vrot.slane %v57_v11, 1 }
  0x33   :  { %v52_v14 = vadd.f32 %v51_v12, %v50_v10  ;;  %v59_v15 = vadd.f32 %v58_v13, %v57_v11 }
  0x35   :  { %v60_v16 = vmul.f32 %v52_v14, %v52_v14  ;;  %v61_v17 = vmul.f32 %v59_v15, %v59_v15 }
  0x37   :  { %v65_v18 = vsel %vm64_vm1, %v61_v17, %v60_v16 }
  0x38   :  { %v68_v19 = vsel %vm67_vm2, %v65_v18, 0.0 }
  0x39   :  { %69 = vadd.xlane.f32.xlu0 %v68_v19 }
  0xc6   :  { %v70_v28 = vpop.xlane.xlu0 %69 }
  0xc7   :  { %v71_v29 = vmax.f32 %v70_v28, 6.4e-11 }
  0xc9   :  { %224 = vrsqrt.f32 %v71_v29 }
  0xd3   :  { %v225_v30 = vpop.eup %224 }
  0xd4   :  { %v74_v31 = vrot.slane %v225_v30, 1  ;;  %v77_v33 = vmul.f32 %v225_v30, %v52_v14 }
  0xd6   :  { %v78_v32 = vmul.f32 %v74_v31, %v59_v15 }
  0xd8   :  { %v85_v34 = vrot.slane %v78_v32, 7 }
  0xda   :  { %v86_v35 = vsel %vm64_vm1, %v85_v34, %v77_v33 }
  0xdb   :  { %207 = vmatmul.mubr.msk.f32.vlgmr.msra.gmra.mrb[0].mxu0 %vm45_vm0, %v86_v35  ;;  %161 = vst.msk [vmem:[#allocation8] sm:$0x3] %vm67_vm2, %v86_v35 }
  0xdc   :  { %281 = shalt.err (!%p278_p6)
}
  0xdd   :  { %s282_s14 = scalar_lea.hbm %s409_s3, 32 }
  0xde   :  { %p283_p7 = scmp.ne.s32.totalorder %s409_s3, %s282_s14  ;;  %p286_p8 = scmp.lt.u32.totalorder %s282_s14, %s409_s3 }
  0xe0   :  { %p288_p9 = pnand %p286_p8, %p283_p7 }
  0xe2   :  { %291 = shalt.err (!%p288_p9)
}
  0xe3   :  { %181 = dma.vmem_to_hbm [thread:$0]  %s179_s10, 32, %s409_s3, [#allocation9]  }
  0xe4   :  { %s330_s21 = smov [#allocation7]  }
  0xe5   :  { %s168_s22 = sshll.u32 %s330_s21, 4  ;;  %s169_s22 = int_to_ptr.vmem [resolvable:$true] %s168_s22 }
  0xe6   :  { %s292_s23 = scalar_lea.vmem %s169_s22, 32  ;;  %p297_p11 = scmp.lt.s32.totalorder %s169_s22, %s169_s22 }
  0xe7   :  { %p293_p10 = scmp.ne.s32.totalorder %s169_s22, %s292_s23  ;;  %p298_p12 = scmp.lt.s32.totalorder %s292_s23, %s292_s23 }
  0xe9   :  { %p299_p13 = por %p298_p12, %p297_p11 }
  0xeb   :  { %p300_p0 = pnand %p299_p13, %p293_p10 }
 0x1ae   :  { %v155_v36 = vpop.f32.mrb[0].mxu0 }
 0x1af   :  { %159 = vst [vmem:[#allocation7] sm:$0x3] %v155_v36  ;;  %v208_v37 = vpop.f32.mrb[1].mxu0 }
 0x1b0   :  { %303 = shalt.err (!%p300_p0)
}
 0x1b1   :  { %s304_s26 = scalar_lea.hbm %s408_s2, 32 }
 0x1b2   :  { %p305_p1 = scmp.ne.s32.totalorder %s408_s2, %s304_s26  ;;  %p308_p2 = scmp.lt.u32.totalorder %s304_s26, %s408_s2 }
 0x1b4   :  { %p310_p3 = pnand %p308_p2, %p305_p1 }
 0x1b6   :  { %313 = shalt.err (!%p310_p3)
}
 0x1b7   :  { %171 = dma.vmem_to_hbm [thread:$0]  %s169_s22, 32, %s408_s2, [#allocation4]  }
 0x1b8   :  { %318 = dma.done.wait [#allocation4], 32  }
 0x1b9   :  { %319 = vsyncadd [#allocation4], 4294967264 }
 0x1ba   :  { %320 = dma.done.wait [#allocation9], 32  }
 0x1bb   :  { %321 = vsyncadd [#allocation9], 4294967264 }
 0x1bc   :  { %188 = vsyncpa [#allocation3], 1 }
 0x1bd   :  { %189 = vsyncpa [#allocation6], 1 }
 0x1be   :  { %190 = vsyncpa [#allocation4], 1 }
 0x1bf   :  { %191 = vsyncpa [#allocation9], 1 }

</bundles_post_ra>
